<compile_context>
chip_gen: v5e
topology: v5e:2x2
jax: 0.10.0
libtpu: 0.0.40
codegen_flags: <defaults>
</compile_context>

<pallas_src>
from functools import partial

import jax
import jax.numpy as jnp
from jax import lax
from jax.experimental import pallas as pl
from jax.experimental.pallas import tpu as pltpu


# ----------------------------- Pallas kernel ------------------------------

def _make_masd_kernel(true_b, tile_b):
    """Kernel closure over the (static) true batch size and lane tile."""
    need_mask = (true_b % tile_b) != 0

    def kernel(logd_ref, asd_ref, out_ref):
        # logd_ref, asd_ref : (N, tile_b)   N = nbest candidate paths
        # out_ref           : (1, tile_b)   per-batch loss
        logd = logd_ref[...].astype(jnp.float32)
        asd = asd_ref[...].astype(jnp.float32)
        n = logd.shape[0]

        if need_mask:
            # Partial last block: zero the out-of-range lanes so garbage VMEM
            # can never turn into inf/NaN (lane-local anyway; OOB output lanes
            # are masked on writeback). Free filler on a DMA-bound kernel.
            lane = lax.broadcasted_iota(jnp.int32, logd.shape, 1)
            valid = (pl.program_id(0) * tile_b + lane) < true_b
            logd = jnp.where(valid, logd, 0.0)
            asd = jnp.where(valid, asd, 0.0)

        # Numerically stable softmax numerator over the nbest axis (axis 0),
        # with the normalization deferred to a single (1, B) exact reciprocal.
        m = jnp.max(logd, axis=0, keepdims=True)                 # (1, B)
        e = jnp.exp(logd - m)                                    # (N, B)
        s = jnp.sum(e, axis=0, keepdims=True)                    # (1, B)

        # normalized_score=True: subtract per-batch mean over nbest (N static).
        asd_norm = asd - jnp.sum(asd, axis=0, keepdims=True) * (1.0 / n)

        num = jnp.sum(e * asd_norm, axis=0, keepdims=True)       # (1, B)
        out_ref[...] = num * pl.reciprocal(s, approx=False)      # exact

    return kernel


# ------------------------------- tiling ------------------------------------

def _round_up(x, m):
    return ((x + m - 1) // m) * m


def _pick_tile_b(n, b, vmem_budget_bytes=12 << 20, max_tile=32768, target_steps=2):
    """Lane tile (multiple of 128) for the batch axis.

    * Budget against scoped VMEM with sublane padding (rows pad to 8):
      12 MiB keeps us under v5e's 16 MiB scoped default (v6e/v7x have more).
    * Large cap (32768 lanes) so big batches are bandwidth-, not grid-overhead-
      bound.
    * Aim for >= target_steps grid steps so v7x's 2nd TensorCore gets work on
      the "parallel" axis; the extra ~0.35us step is noise on 1-TC chips.
    """
    if b <= 128:
        return b                       # single full-extent block, no padding
    n_pad = _round_up(n, 8)
    # f32 worst case; 2 inputs (n_pad rows) + 1 output (8 rows), double-buffered.
    per_lane_bytes = 4 * (2 * n_pad + 8) * 2
    cap = (vmem_budget_bytes // per_lane_bytes) // 128 * 128
    cap = int(max(128, min(cap, max_tile)))
    blocks = pl.cdiv(b, 128)
    tile_blocks = max(1, pl.cdiv(blocks, target_steps))
    return int(min(cap, tile_blocks * 128))


# --------------------------- forward dispatcher -----------------------------

_PALLAS_MIN_ELEMS = 1 << 14  # below this, a fused jnp expression is cheaper


def _masd_perbatch_impl(logd, asd, use_pallas):
    n, b = logd.shape

    if not use_pallas:
        # Tiny problems: one fused XLA kernel beats pallas_call dispatch.
        logd32 = logd.astype(jnp.float32)
        asd32 = asd.astype(jnp.float32)
        p = jax.nn.softmax(logd32, axis=0)
        return jnp.sum(p * (asd32 - jnp.mean(asd32, axis=0)), axis=0)

    tile_b = _pick_tile_b(n, b)
    grid_b = pl.cdiv(b, tile_b)
    kernel = _make_masd_kernel(b, tile_b)

    out = pl.pallas_call(
        kernel,
        out_shape=jax.ShapeDtypeStruct((1, b), jnp.float32),
        grid=(grid_b,),
        in_specs=[
            pl.BlockSpec((n, tile_b), lambda j: (0, j)),
            pl.BlockSpec((n, tile_b), lambda j: (0, j)),
        ],
        out_specs=pl.BlockSpec((1, tile_b), lambda j: (0, j)),
        compiler_params=pltpu.CompilerParams(
            dimension_semantics=("parallel",)),
    )(logd, asd)
    return out[0]


@partial(jax.custom_vjp, nondiff_argnums=(2,))
def _masd_perbatch(logd, asd, use_pallas):
    return _masd_perbatch_impl(logd, asd, use_pallas)


def _masd_perbatch_fwd(logd, asd, use_pallas):
    return _masd_perbatch_impl(logd, asd, use_pallas), (logd, asd)


def _masd_perbatch_bwd(use_pallas, res, g):
    # Analytic backward (pure JAX, cheap): L_b = sum_i p_i (a_i - mean(a))
    #   dL/dlogd_k = p_k (a_k - L_b),  dL/dasd_k = p_k - 1/n
    logd, asd = res
    n = logd.shape[0]
    logd32 = logd.astype(jnp.float32)
    asd32 = asd.astype(jnp.float32)
    p = jax.nn.softmax(logd32, axis=0)                         # (n, b)
    a = asd32 - jnp.mean(asd32, axis=0, keepdims=True)         # (n, b)
    loss_b = jnp.sum(p * a, axis=0, keepdims=True)             # (1, b)
    g = g[None, :].astype(jnp.float32)                         # (1, b)
    dlogd = (g * p * (a - loss_b)).astype(logd.dtype)
    dasd = (g * (p - 1.0 / n)).astype(asd.dtype)
    return dlogd, dasd


_masd_perbatch.defvjp(_masd_perbatch_fwd, _masd_perbatch_bwd)


def masd_loss(nbest_log_distribution, asd_scores, reduction="mean", use_pallas=None):
    """Pallas implementation of Seq2seqMASDLoss.forward numeric core.

    Args:
      nbest_log_distribution: (nbest, batch) float (f32 or bf16)
      asd_scores:             (nbest, batch) float (f32 or bf16)
      reduction: 'mean' | 'sum' | 'none'
      use_pallas: None -> auto (Pallas only for large problems); True/False force.
    """
    n, b = nbest_log_distribution.shape
    assert asd_scores.shape == (n, b)
    if use_pallas is None:
        use_pallas = (n * b) >= _PALLAS_MIN_ELEMS

    perb = _masd_perbatch(nbest_log_distribution, asd_scores, bool(use_pallas))

    if reduction == "mean":
        return jnp.mean(perb)
    if reduction == "sum":
        return jnp.sum(perb)
    return perb


# ------------------------ plain-Python metric glue -------------------------

def wer(ref: str, hyp: str) -> float:
    """Word error rate via Levenshtein distance on word tokens."""
    r, h = ref.split(), hyp.split()
    d = [[0] * (len(h) + 1) for _ in range(len(r) + 1)]
    for i in range(len(r) + 1):
        d[i][0] = i
    for j in range(len(h) + 1):
        d[0][j] = j
    for i in range(1, len(r) + 1):
        for j in range(1, len(h) + 1):
            cost = 0 if r[i - 1] == h[j - 1] else 1
            d[i][j] = min(d[i - 1][j] + 1, d[i][j - 1] + 1, d[i - 1][j - 1] + cost)
    return d[len(r)][len(h)] / max(len(r), 1)


class Seq2seqMASDLoss:
    """JAX/Pallas port of the PyTorch Seq2seqMASDLoss module (forward)."""

    def __init__(self, sampling_method="beam_search", candidate_paths_num=2,
                 reduction="mean", eos_id=33):
        self.candidate_paths_num = candidate_paths_num
        self.sampling_method = sampling_method
        self.reduction = reduction
        self.eos_id = eos_id

    def forward(self, nbest_log_distribution, ref_list, hyp_list,
                metric_model=None, metric_tokenizer=None, use_asd=0):
        asd_scores = []
        for hyp_group in hyp_list:                 # nbest groups
            path_scores = []
            for ref, hyp in zip(ref_list, hyp_group):
                if use_asd == 1:
                    # TODO(synk): BERT hidden-state DTW ASD metric has no Pallas
                    # equivalent (external model + tokenizer); fall back to WER.
                    path_scores.append(wer(ref, hyp))
                else:
                    path_scores.append(wer(ref, hyp))
            asd_scores.append(path_scores)
        # Build scores in the distribution's dtype so a bf16 model path halves
        # the kernel's input DMA bytes for free (kernel up-casts to f32).
        asd_scores_tensor = jnp.asarray(asd_scores,
                                        dtype=nbest_log_distribution.dtype)
        return masd_loss(nbest_log_distribution, asd_scores_tensor,
                         reduction=self.reduction)


# --------------------------------- main ------------------------------------

if __name__ == "__main__":
    nbest, batch = 2, 4
    key = jax.random.PRNGKey(0)

    # nbest path log-probabilities (nbest, batch)
    nbest_log_distribution = jax.random.normal(key, (nbest, batch), jnp.float32) * 2.0

    # deterministic toy references / hypotheses (batch refs, nbest hyp groups)
    ref_list = [
        "the cat sat on the mat",
        "speech recognition is fun",
        "pallas kernels run on tpu",
        "hello world again",
    ]
    hyp_list = [
        [  # candidate path 0
            "the cat sat on the mat",
            "speech recognition was fun",
            "pallas kernel run on tpu",
            "hello world",
        ],
        [  # candidate path 1
            "a cat sat on a mat",
            "speech recognition is fun",
            "pallas kernels run on gpu",
            "hello there world again",
        ],
    ]

    loss_mod = Seq2seqMASDLoss(candidate_paths_num=nbest, reduction="mean")
    loss = loss_mod.forward(nbest_log_distribution, ref_list, hyp_list,
                            metric_model=None, metric_tokenizer=None, use_asd=0)
    loss = jax.block_until_ready(loss)

    # pure-JAX reference of compute_masd_loss_ver2 (normalized_score=True)
    asd = jnp.asarray([[wer(r, h) for r, h in zip(ref_list, hg)] for hg in hyp_list],
                      dtype=jnp.float32)
    p = jax.nn.softmax(nbest_log_distribution, axis=0)
    ref_perb = jnp.sum(p * (asd - jnp.mean(asd, axis=0)), axis=0)
    ref_loss = jnp.mean(ref_perb)
    assert jnp.allclose(loss, ref_loss, atol=1e-5), (loss, ref_loss)

    # force the Pallas path at the same small size (auto uses the jnp fallback)
    loss_pl = jax.block_until_ready(
        masd_loss(nbest_log_distribution, asd, "mean", use_pallas=True))
    assert jnp.allclose(loss_pl, ref_loss, atol=1e-5), (loss_pl, ref_loss)

    # 'none' / 'sum' reductions through the Pallas path
    perb = masd_loss(nbest_log_distribution, asd, "none", use_pallas=True)
    assert jnp.allclose(perb, ref_perb, atol=1e-5)
    sum_pl = masd_loss(nbest_log_distribution, asd, "sum", use_pallas=True)
    assert jnp.allclose(sum_pl, jnp.sum(ref_perb), atol=1e-5)

    # batch not a multiple of 128 -> partial last block + in-kernel lane mask
    b2 = 300
    k1, k2 = jax.random.split(key)
    logd2 = jax.random.normal(k1, (4, b2), jnp.float32)
    asd2 = jax.random.uniform(k2, (4, b2), jnp.float32)
    l2 = jax.block_until_ready(masd_loss(logd2, asd2, "mean", use_pallas=True))
    p2 = jax.nn.softmax(logd2, axis=0)
    r2 = jnp.mean(jnp.sum(p2 * (asd2 - jnp.mean(asd2, axis=0)), axis=0))
    assert jnp.allclose(l2, r2, atol=1e-5), (l2, r2)

    # larger batch: auto-dispatch chooses Pallas, grid has >=2 parallel steps
    b3 = 4096
    k3, k4 = jax.random.split(k1)
    logd3 = jax.random.normal(k3, (4, b3), jnp.float32)
    asd3 = jax.random.uniform(k4, (4, b3), jnp.float32)
    l3 = jax.block_until_ready(masd_loss(logd3, asd3, "mean"))
    p3 = jax.nn.softmax(logd3, axis=0)
    r3 = jnp.mean(jnp.sum(p3 * (asd3 - jnp.mean(asd3, axis=0)), axis=0))
    assert jnp.allclose(l3, r3, atol=1e-5), (l3, r3)

    # gradient through the Pallas forward (custom_vjp, analytic pure-JAX bwd)
    g_pl = jax.grad(lambda x: masd_loss(x, asd3, "mean", use_pallas=True))(logd3)
    g_ref = jax.grad(
        lambda x: jnp.mean(jnp.sum(jax.nn.softmax(x, axis=0)
                                   * (asd3 - jnp.mean(asd3, axis=0)), axis=0)))(logd3)
    g_pl = jax.block_until_ready(g_pl)
    assert jnp.allclose(g_pl, g_ref, atol=1e-6), "gradient mismatch"

    print("KERNEL_OK")
</pallas_src>

<mosaic_0001>
module attributes {stable_mosaic.version = 11 : i64} {
  func.func @kernel(%arg0: i32, %arg1: memref<2x4xf32, #tpu.memory_space<vmem>>, %arg2: memref<2x4xf32, #tpu.memory_space<vmem>>, %arg3: memref<1x4xf32, #tpu.memory_space<vmem>>) attributes {dimension_semantics = [#tpu.dimension_semantics<parallel>], iteration_bounds = array<i64: 1>, scalar_prefetch = 0 : i64, scratch_operands = 0 : i64, tpu.core_type = #tpu.core_type<tc>, window_params = [{transform_indices = @transform_0, window_bounds = array<i64: 2, 4>}, {transform_indices = @transform_1, window_bounds = array<i64: 2, 4>}, {transform_indices = @transform_2, window_bounds = array<i64: 1, 4>}]} {
    %c0 = arith.constant 0 : index
    %c0_0 = arith.constant 0 : index
    %0 = vector.load %arg1[%c0, %c0_0] : memref<2x4xf32, #tpu.memory_space<vmem>>, vector<2x4xf32>
    %c0_1 = arith.constant 0 : index
    %c0_2 = arith.constant 0 : index
    %1 = vector.load %arg2[%c0_1, %c0_2] : memref<2x4xf32, #tpu.memory_space<vmem>>, vector<2x4xf32>
    %cst = arith.constant dense<0xFF800000> : vector<4xf32>
    %2 = vector.multi_reduction <maximumf>, %0, %cst [0] : vector<2x4xf32> to vector<4xf32>
    %3 = vector.shape_cast %2 : vector<4xf32> to vector<1x4xf32>
    %4 = vector.broadcast %3 : vector<1x4xf32> to vector<2x4xf32>
    %5 = arith.subf %0, %4 : vector<2x4xf32>
    %6 = math.exp %5 : vector<2x4xf32>
    %cst_3 = arith.constant dense<0.000000e+00> : vector<4xf32>
    %7 = vector.multi_reduction <add>, %6, %cst_3 [0] : vector<2x4xf32> to vector<4xf32>
    %8 = vector.shape_cast %7 : vector<4xf32> to vector<1x4xf32>
    %cst_4 = arith.constant dense<0.000000e+00> : vector<4xf32>
    %9 = vector.multi_reduction <add>, %1, %cst_4 [0] : vector<2x4xf32> to vector<4xf32>
    %10 = vector.shape_cast %9 : vector<4xf32> to vector<1x4xf32>
    %cst_5 = arith.constant 5.000000e-01 : f32
    %11 = vector.broadcast %cst_5 : f32 to vector<1x4xf32>
    %12 = arith.mulf %10, %11 : vector<1x4xf32>
    %13 = vector.broadcast %12 : vector<1x4xf32> to vector<2x4xf32>
    %14 = arith.subf %1, %13 : vector<2x4xf32>
    %15 = arith.mulf %6, %14 : vector<2x4xf32>
    %cst_6 = arith.constant dense<0.000000e+00> : vector<4xf32>
    %16 = vector.multi_reduction <add>, %15, %cst_6 [0] : vector<2x4xf32> to vector<4xf32>
    %17 = vector.shape_cast %16 : vector<4xf32> to vector<1x4xf32>
    %18 = tpu.reciprocal %8 : vector<1x4xf32> -> vector<1x4xf32>
    %19 = arith.mulf %17, %18 : vector<1x4xf32>
    %c0_7 = arith.constant 0 : index
    %c0_8 = arith.constant 0 : index
    %20 = vector.load %arg3[%c0_7, %c0_8] : memref<1x4xf32, #tpu.memory_space<vmem>>, vector<1x4xf32>
    tpu.vector_store %arg3[%c0_7, %c0_8], %19 {strides = array<i32>} : memref<1x4xf32, #tpu.memory_space<vmem>>, vector<1x4xf32>,
    return
  }
  func.func @transform_0(%arg0: i32) -> (i32, i32) {
    %c0_i32 = arith.constant 0 : i32
    %c0_i32_0 = arith.constant 0 : i32
    return %c0_i32, %arg0 : i32, i32
  }
  func.func @transform_1(%arg0: i32) -> (i32, i32) {
    %c0_i32 = arith.constant 0 : i32
    %c0_i32_0 = arith.constant 0 : i32
    return %c0_i32, %arg0 : i32, i32
  }
  func.func @transform_2(%arg0: i32) -> (i32, i32) {
    %c0_i32 = arith.constant 0 : i32
    %c0_i32_0 = arith.constant 0 : i32
    return %c0_i32, %arg0 : i32, i32
  }
}

</mosaic_0001>

<bundles_post_ra>
// kernel: tpu_custom_call.1
= control target key start
LH: loop header
LB: loop body
LE: loop exit
PB: predicated region body
PF: predicated region fallthrough
CT: control target
= control target key end

     0   :  { %7 = vsyncpa [#allocation3], 0  ;;  %s228_s0 = inlined_call_operand.hbm [shape: f32[2,4], index: 0, kind: input, shape index: {}]   ;;  %s229_s1 = inlined_call_operand.hbm [shape: f32[2,4], index: 1, kind: input, shape index: {}]   ;;  %s230_s2 = inlined_call_operand.hbm [shape: f32[1,4], index: 2, kind: output, shape index: {}]  }
   0x1   :  { %8 = vsyncpa [#allocation6], 0 }
   0x2   :  { %9 = vsyncpa [#allocation4], 0  ;;  %s15_s11 = sshll.u32 %s228_s0, 4  ;;  %s197_s12 = smov [#allocation2]   ;;  %s16_s11 = int_to_ptr.hbm [resolvable:$true] %s15_s11 }
   0x3   :  { %s17_s13 = sshll.u32 %s197_s12, 4  ;;  %s26_s16 = sshll.u32 %s229_s1, 4  ;;  %s18_s13 = int_to_ptr.vmem [resolvable:$true] %s17_s13  ;;  %s27_s16 = int_to_ptr.hbm [resolvable:$true] %s26_s16 }
   0x4   :  { %20 = dma.hbm_to_vmem [thread:$0]  %s16_s11, 32, %s18_s13, [#allocation3]  }
   0x5   :  { %s198_s17 = smov [#allocation5]  }
   0x6   :  { %s28_s18 = sshll.u32 %s198_s17, 4  ;;  %s29_s18 = int_to_ptr.vmem [resolvable:$true] %s28_s18 }
   0x7   :  { %31 = dma.hbm_to_vmem [thread:$0]  %s27_s16, 32, %s29_s18, [#allocation6]  }
   0x8   :  { %191 = dma.done.wait [#allocation3], 32  }
   0x9   :  { %192 = vsyncadd [#allocation3], 4294967264 }
   0xa   :  { %193 = dma.done.wait [#allocation6], 32  }
   0xb   :  { %194 = vsyncadd [#allocation6], 4294967264  ;;  %vm42_vm0 = vcmask 25600   ;;  %v40_v0 = vld [vmem:[#allocation2] sm:$0x3]  ;;  %s199_s0 = smov [#allocation7]  }
   0xc   :  { %v41_v1 = vld [vmem:[#allocation5] sm:$0x3]  ;;  %v43_v2 = vsel %vm42_vm0, %v40_v0, -inf  ;;  %s99_s1 = sshll.u32 %s199_s0, 4  ;;  %s101_s21 = sshll.u32 %s230_s2, 4  ;;  %vm92_vm5 = vcmask 24576   ;;  %s100_s1 = int_to_ptr.vmem [resolvable:$true] %s99_s1  ;;  %s102_s21 = int_to_ptr.hbm [resolvable:$true] %s101_s21 }
   0xd   :  { %v60_v3 = vsel %vm42_vm0, %v41_v1, 0.0  ;;  %v44_v4 = vrot.slane %v43_v2, 4 }
   0xe   :  { %v61_v5 = vrot.slane %v60_v3, 4 }
   0xf   :  { %v45_v6 = vmax.f32 %v43_v2, %v44_v4 }
  0x10   :  { %v62_v7 = vadd.f32 %v61_v5, %v60_v3 }
  0x11   :  { %v46_v8 = vrot.slane %v45_v6, 2 }
  0x12   :  { %v63_v9 = vrot.slane %v62_v7, 2 }
  0x13   :  { %v47_v10 = vmax.f32 %v45_v6, %v46_v8 }
  0x14   :  { %v64_v11 = vadd.f32 %v63_v9, %v62_v7 }
  0x15   :  { %v48_v12 = vrot.slane %v47_v10, 1 }
  0x16   :  { %v65_v13 = vrot.slane %v64_v11, 1 }
  0x17   :  { %v49_v14 = vmax.f32 %v47_v10, %v48_v12 }
  0x18   :  { %v66_v15 = vadd.f32 %v65_v13, %v64_v11 }
  0x19   :  { %v50_v16 = vsub.f32 %v40_v0, %v49_v14 }
  0x1a   :  { %v67_v18 = vmul.f32 0.5, %v66_v15 }
  0x1b   :  { %v51_v17 = vmul.f32 1.442695, %v50_v16 }
  0x1c   :  { %v68_v19 = vsub.f32 %v41_v1, %v67_v18 }
  0x1d   :  { %115 = vpow2.f32 %v51_v17 }
  0x23   :  { %v116_v20 = vpop.eup %115 }
  0x24   :  { %v53_v21 = vsel %vm42_vm0, %v116_v20, 0.0  ;;  %v69_v22 = vmul.f32 %v116_v20, %v68_v19 }
  0x25   :  { %v54_v23 = vrot.slane %v53_v21, 4 }
  0x26   :  { %v70_v24 = vsel %vm42_vm0, %v69_v22, 0.0 }
  0x27   :  { %v55_v25 = vadd.f32 %v54_v23, %v53_v21  ;;  %v71_v27 = vrot.slane %v70_v24, 4 }
  0x29   :  { %v56_v26 = vrot.slane %v55_v25, 2  ;;  %v72_v30 = vadd.f32 %v71_v27, %v70_v24 }
  0x2b   :  { %v57_v28 = vadd.f32 %v56_v26, %v55_v25  ;;  %v73_v32 = vrot.slane %v72_v30, 2 }
  0x2d   :  { %v58_v29 = vrot.slane %v57_v28, 1  ;;  %v74_v33 = vadd.f32 %v73_v32, %v72_v30 }
  0x2f   :  { %v59_v31 = vadd.f32 %v58_v29, %v57_v28  ;;  %v75_v36 = vrot.slane %v74_v33, 1 }
  0x31   :  { %117 = vrcp.f32 %v59_v31  ;;  %v88_v37 = vand.u32 2147483648, %v59_v31  ;;  %vm82_vm1 = vweird.f32 %v59_v31  ;;  %v86_v39 = vand.u32 2147483647, %v59_v31 }
  0x32   :  { %v76_v42 = vadd.f32 %v75_v36, %v74_v33 }
  0x33   :  { %v89_v41 = vor.u32 1.1754944e-38, %v88_v37  ;;  %vm87_vm4 = vcmp.eq.f32.partialorder %v86_v39, 8.507059e+37 }
  0x37   :  { %v118_v34 = vpop.eup %117 }
  0x38   :  { %v78_v35 = vmul.f32 %v118_v34, %v59_v31  ;;  %vm83_vm2 = vweird.f32 %v118_v34 }
  0x39   :  { %vm84_vm3 = vmor %vm82_vm1, %vm83_vm2 }
  0x3a   :  { %v79_v38 = vsub.f32 1.0, %v78_v35 }
  0x3c   :  { %v80_v40 = vmul.f32 %v118_v34, %v79_v38 }
  0x3e   :  { %v81_v43 = vadd.f32 %v118_v34, %v80_v40 }
  0x40   :  { %v85_v44 = vsel %vm84_vm3, %v118_v34, %v81_v43 }
  0x41   :  { %v90_v45 = vsel %vm87_vm4, %v89_v41, %v85_v44 }
  0x42   :  { %v91_v46 = vmul.f32 %v90_v45, %v76_v42 }
  0x44   :  { %93 = vst.msk [vmem:[#allocation7] sm:$0x1] %vm92_vm5, %v91_v46 }
  0x45   :  { %104 = dma.vmem_to_hbm [thread:$0]  %s100_s1, 16, %s102_s21, [#allocation4]  }
  0x46   :  { %195 = dma.done.wait [#allocation4], 16  }
  0x47   :  { %196 = vsyncadd [#allocation4], 4294967280 }
  0x48   :  { %109 = vsyncpa [#allocation3], 1 }
  0x49   :  { %110 = vsyncpa [#allocation6], 1 }
  0x4a   :  { %111 = vsyncpa [#allocation4], 1 }

</bundles_post_ra>
